<compile_context>
chip_gen: v5e
topology: v5e:2x2
jax: 0.10.0
libtpu: 0.0.40
codegen_flags: <defaults>
</compile_context>

<pallas_src>
from functools import partial

import jax
import jax.numpy as jnp
from jax import lax
from jax.experimental import pallas as pl
from jax.experimental.pallas import tpu as pltpu


def _geovec_mlp_kernel(x_ref, a1_ref, b1_ref, a2_ref, b2_ref, o_ref):
    # x_ref : (3V, BT)   folded input tile, batch on lanes
    # a1_ref: (3Vn, 3V)  kron(W1, I3), VMEM-resident
    # b1_ref: (3Vn, 1)   Linear1 bias column, f32 (lane-broadcast in kernel)
    # a2_ref: (3V, 3Vn)  kron(W2, I3), VMEM-resident
    # b2_ref: (3V, 1)    Linear2 bias column, f32
    # o_ref : (3V, BT)
    #
    # f32 operands -> true-f32 matmul (HIGHEST); bf16 operands -> single bf16
    # MXU pass with f32 accumulation (the explicit fast path).
    prec = (lax.Precision.HIGHEST if a1_ref.dtype == jnp.float32
            else lax.Precision.DEFAULT)

    x = x_ref[...]

    # Linear1 (GeoVecLinear expand) + bias, ReLU  (bias/ReLU in f32 on the VPU)
    h = jnp.dot(a1_ref[...], x, preferred_element_type=jnp.float32,
                precision=prec)
    h = jnp.maximum(h + b1_ref[...], 0.0)

    # Linear2 (GeoVecLinear contract) + bias, residual add
    y = jnp.dot(a2_ref[...], h.astype(a2_ref.dtype),
                preferred_element_type=jnp.float32, precision=prec)
    y = y + b2_ref[...]

    o_ref[...] = (y + x.astype(jnp.float32)).astype(o_ref.dtype)


def _pick_bt(B, bt_max):
    """Batch-tile (lane) width: multiple of 128, capped by bt_max, and chosen so
    the grid has >= 2 steps whenever B allows it (lets v7x shard the 'parallel'
    axis across its two TensorCores)."""
    bt_max = max(128, (int(bt_max) // 128) * 128)   # review: force 128-multiple
    n128 = pl.cdiv(B, 128)
    if n128 <= 1:
        return 128
    chunks = min(bt_max // 128, pl.cdiv(n128, 2))   # >= 2 grid steps if possible
    return 128 * max(1, chunks)


@partial(jax.jit, static_argnames=("bt_max", "io_dtype"))
def geovec_mlp_relu_folded(xt, w1, b1, w2, b2, *, bt_max=16384, io_dtype=None):
    """Preferred zero-copy entry point.

    xt: (3*V, B) lane-dense activations with xt[v*3 + c, b] = vec[b, v, c].
    w1: (Vn, V), b1: (Vn, 3), w2: (V, Vn), b2: (V, 3).
    Returns (3*V, B) in io_dtype (defaults to xt.dtype).  No layout copies are
    performed here — callers that keep activations folded pay zero transpose
    HBM traffic.
    """
    V3, B = xt.shape
    Vn = w1.shape[0]
    Vn3 = 3 * Vn
    dt_io = jnp.dtype(io_dtype) if io_dtype is not None else xt.dtype

    # Tiny coordinate-expanded weights (stay VMEM-resident) + f32 bias columns.
    eye3 = jnp.eye(3, dtype=jnp.float32)
    a1 = jnp.kron(w1.astype(jnp.float32), eye3).astype(dt_io)   # (Vn3, V3)
    a2 = jnp.kron(w2.astype(jnp.float32), eye3).astype(dt_io)   # (V3, Vn3)
    b1c = b1.astype(jnp.float32).reshape(Vn3, 1)                # (Vn3, 1)
    b2c = b2.astype(jnp.float32).reshape(V3, 1)                 # (V3, 1)

    xt = xt.astype(dt_io)

    BT = _pick_bt(B, bt_max)
    Bp = pl.cdiv(B, BT) * BT
    if Bp != B:
        xt = jnp.pad(xt, ((0, 0), (0, Bp - B)))

    out = pl.pallas_call(
        _geovec_mlp_kernel,
        out_shape=jax.ShapeDtypeStruct((V3, Bp), dt_io),
        grid=(Bp // BT,),
        in_specs=[
            pl.BlockSpec((V3, BT), lambda i: (0, i)),     # x tile, batch on lanes
            pl.BlockSpec((Vn3, V3), lambda i: (0, 0)),    # A1 (resident)
            pl.BlockSpec((Vn3, 1), lambda i: (0, 0)),     # b1 column (resident)
            pl.BlockSpec((V3, Vn3), lambda i: (0, 0)),    # A2 (resident)
            pl.BlockSpec((V3, 1), lambda i: (0, 0)),      # b2 column (resident)
        ],
        out_specs=pl.BlockSpec((V3, BT), lambda i: (0, i)),
        compiler_params=pltpu.CompilerParams(
            dimension_semantics=("parallel",),            # shard tiles across TCs
            vmem_limit_bytes=48 * 1024 * 1024,
        ),
    )(xt, a1, b1c, a2, b2c)

    return out[:, :B] if Bp != B else out


@partial(jax.jit, static_argnames=("bt_max", "io_dtype"))
def geovec_mlp_relu(vec, w1, b1, w2, b2, *, bt_max=16384, io_dtype=None):
    """Module-compatible interface: vec (B, V, 3) -> (B, V, 3).

    NOTE: this path pays one fused transpose per direction to reach the
    lane-dense layout; performance-critical callers should keep activations
    folded and call geovec_mlp_relu_folded directly (zero layout copies).
    """
    B, V, _ = vec.shape
    xt = jnp.transpose(vec, (1, 2, 0)).reshape(3 * V, B)
    out_t = geovec_mlp_relu_folded(xt, w1, b1, w2, b2,
                                   bt_max=bt_max, io_dtype=io_dtype)
    out = jnp.transpose(out_t.reshape(V, 3, B), (2, 0, 1))
    return out.astype(vec.dtype)


def _reference(vec, w1, b1, w2, b2):
    hp = lax.Precision.HIGHEST
    h = jnp.einsum('uv,bvc->buc', w1, vec, precision=hp) + b1[None]
    h = jnp.maximum(h, 0.0)
    y = jnp.einsum('wu,buc->bwc', w2, h, precision=hp) + b2[None]
    return y + vec


if __name__ == "__main__":
    # Shapes consistent with the module: num_vec_in=8, n=2.
    V, n = 8, 2
    Vn = V * n

    key = jax.random.PRNGKey(0)
    k0, k1, k2, k3, k4 = jax.random.split(key, 5)

    # Parameter shapes from __init__:
    #   Linear1.Linear.weight: (Vn, V), Linear1.bias: (Vn, 3)
    #   Linear2.Linear.weight: (V, Vn), Linear2.bias: (V, 3)
    # (Random values — torch's zero-init of Linear2 would make the MLP branch
    #  trivially zero and not exercise the compute path.)
    w1 = 0.3 * jax.random.normal(k1, (Vn, V), dtype=jnp.float32)
    b1 = 0.1 * jax.random.normal(k2, (Vn, 3), dtype=jnp.float32)
    w2 = 0.3 * jax.random.normal(k3, (V, Vn), dtype=jnp.float32)
    b2 = 0.1 * jax.random.normal(k4, (V, 3), dtype=jnp.float32)

    # Case 1: module interface, tiny batch (single padded tile), f32.
    vec_small = jax.random.normal(k0, (2, V, 3), dtype=jnp.float32)
    out = jax.block_until_ready(geovec_mlp_relu(vec_small, w1, b1, w2, b2))
    ref = _reference(vec_small, w1, b1, w2, b2)
    assert out.shape == vec_small.shape and out.dtype == vec_small.dtype
    assert jnp.allclose(out, ref, atol=1e-3, rtol=1e-3), "mismatch (small, f32)"

    # Case 2: module interface, batch not a tile multiple and bt_max not a
    # multiple of 128 — exercises bt_max rounding, multi-step grid, resident
    # weights across steps, and remainder padding/slicing.
    vec_big = jax.random.normal(k0, (300, V, 3), dtype=jnp.float32)
    out2 = jax.block_until_ready(
        geovec_mlp_relu(vec_big, w1, b1, w2, b2, bt_max=200))
    ref2 = _reference(vec_big, w1, b1, w2, b2)
    assert out2.shape == vec_big.shape
    assert jnp.allclose(out2, ref2, atol=1e-3, rtol=1e-3), "mismatch (tiled, f32)"

    # Case 3: lane-dense folded entry point (zero wrapper transposes) with the
    # bf16 streaming fast path; 2-step grid from the default tile picker.
    xt = jnp.transpose(vec_big, (1, 2, 0)).reshape(3 * V, vec_big.shape[0])
    out3 = jax.block_until_ready(
        geovec_mlp_relu_folded(xt, w1, b1, w2, b2, io_dtype=jnp.bfloat16))
    ref3 = jnp.transpose(ref2, (1, 2, 0)).reshape(3 * V, vec_big.shape[0])
    assert out3.shape == ref3.shape
    assert jnp.allclose(out3.astype(jnp.float32), ref3, atol=1e-1, rtol=1e-1), \
        "mismatch (folded, bf16)"

    print("KERNEL_OK")
</pallas_src>

<mosaic_0001>
module attributes {stable_mosaic.version = 11 : i64} {
  func.func @_geovec_mlp_kernel(%arg0: i32, %arg1: memref<24x128xf32, #tpu.memory_space<vmem>>, %arg2: memref<48x24xf32, #tpu.memory_space<vmem>>, %arg3: memref<48x1xf32, #tpu.memory_space<vmem>>, %arg4: memref<24x48xf32, #tpu.memory_space<vmem>>, %arg5: memref<24x1xf32, #tpu.memory_space<vmem>>, %arg6: memref<24x128xf32, #tpu.memory_space<vmem>>) attributes {dimension_semantics = [#tpu.dimension_semantics<parallel>], iteration_bounds = array<i64: 1>, scalar_prefetch = 0 : i64, scratch_operands = 0 : i64, tpu.core_type = #tpu.core_type<tc>, window_params = [{transform_indices = @transform_0, window_bounds = array<i64: 24, 128>}, {pipeline_mode = #tpu.pipeline_mode<synchronous>, transform_indices = @transform_1, window_bounds = array<i64: 48, 24>}, {pipeline_mode = #tpu.pipeline_mode<synchronous>, transform_indices = @transform_2, window_bounds = array<i64: 48, 1>}, {pipeline_mode = #tpu.pipeline_mode<synchronous>, transform_indices = @transform_3, window_bounds = array<i64: 24, 48>}, {pipeline_mode = #tpu.pipeline_mode<synchronous>, transform_indices = @transform_4, window_bounds = array<i64: 24, 1>}, {transform_indices = @transform_5, window_bounds = array<i64: 24, 128>}]} {
    %c0 = arith.constant 0 : index
    %c0_0 = arith.constant 0 : index
    %0 = vector.load %arg1[%c0, %c0_0] : memref<24x128xf32, #tpu.memory_space<vmem>>, vector<24x128xf32>
    %c0_1 = arith.constant 0 : index
    %c0_2 = arith.constant 0 : index
    %1 = vector.load %arg2[%c0_1, %c0_2] : memref<48x24xf32, #tpu.memory_space<vmem>>, vector<48x24xf32>
    %cst = arith.constant dense<0.000000e+00> : vector<48x128xf32>
    %2 = tpu.matmul %1, %0, %cst {dimension_numbers = #tpu.dot_dimension_numbers<[1], [0], [0], [1], [0, 0, 1, 1], [], []>, precision = #tpu.contract_precision<fp32>} : vector<48x24xf32>, vector<24x128xf32>, vector<48x128xf32> -> vector<48x128xf32>
    %c0_3 = arith.constant 0 : index
    %c0_4 = arith.constant 0 : index
    %3 = vector.load %arg3[%c0_3, %c0_4] : memref<48x1xf32, #tpu.memory_space<vmem>>, vector<48x1xf32>
    %4 = vector.broadcast %3 : vector<48x1xf32> to vector<48x128xf32>
    %5 = arith.addf %2, %4 : vector<48x128xf32>
    %cst_5 = arith.constant 0.000000e+00 : f32
    %6 = vector.broadcast %cst_5 : f32 to vector<48x128xf32>
    %7 = arith.maximumf %5, %6 : vector<48x128xf32>
    %c0_6 = arith.constant 0 : index
    %c0_7 = arith.constant 0 : index
    %8 = vector.load %arg4[%c0_6, %c0_7] : memref<24x48xf32, #tpu.memory_space<vmem>>, vector<24x48xf32>
    %cst_8 = arith.constant dense<0.000000e+00> : vector<24x128xf32>
    %9 = tpu.matmul %8, %7, %cst_8 {dimension_numbers = #tpu.dot_dimension_numbers<[1], [0], [0], [1], [0, 0, 1, 1], [], []>, precision = #tpu.contract_precision<fp32>} : vector<24x48xf32>, vector<48x128xf32>, vector<24x128xf32> -> vector<24x128xf32>
    %c0_9 = arith.constant 0 : index
    %c0_10 = arith.constant 0 : index
    %10 = vector.load %arg5[%c0_9, %c0_10] : memref<24x1xf32, #tpu.memory_space<vmem>>, vector<24x1xf32>
    %11 = vector.broadcast %10 : vector<24x1xf32> to vector<24x128xf32>
    %12 = arith.addf %9, %11 : vector<24x128xf32>
    %13 = arith.addf %12, %0 : vector<24x128xf32>
    %c0_11 = arith.constant 0 : index
    %c0_12 = arith.constant 0 : index
    %14 = vector.load %arg6[%c0_11, %c0_12] : memref<24x128xf32, #tpu.memory_space<vmem>>, vector<24x128xf32>
    tpu.vector_store %arg6[%c0_11, %c0_12], %13 {strides = array<i32>} : memref<24x128xf32, #tpu.memory_space<vmem>>, vector<24x128xf32>,
    return
  }
  func.func @transform_0(%arg0: i32) -> (i32, i32) {
    %c0_i32 = arith.constant 0 : i32
    %c0_i32_0 = arith.constant 0 : i32
    return %c0_i32, %arg0 : i32, i32
  }
  func.func @transform_1(%arg0: i32) -> (i32, i32) {
    %c0_i32 = arith.constant 0 : i32
    %c0_i32_0 = arith.constant 0 : i32
    %c0_i32_1 = arith.constant 0 : i32
    return %c0_i32, %c0_i32_0 : i32, i32
  }
  func.func @transform_2(%arg0: i32) -> (i32, i32) {
    %c0_i32 = arith.constant 0 : i32
    %c0_i32_0 = arith.constant 0 : i32
    %c0_i32_1 = arith.constant 0 : i32
    return %c0_i32, %c0_i32_0 : i32, i32
  }
  func.func @transform_3(%arg0: i32) -> (i32, i32) {
    %c0_i32 = arith.constant 0 : i32
    %c0_i32_0 = arith.constant 0 : i32
    %c0_i32_1 = arith.constant 0 : i32
    return %c0_i32, %c0_i32_0 : i32, i32
  }
  func.func @transform_4(%arg0: i32) -> (i32, i32) {
    %c0_i32 = arith.constant 0 : i32
    %c0_i32_0 = arith.constant 0 : i32
    %c0_i32_1 = arith.constant 0 : i32
    return %c0_i32, %c0_i32_0 : i32, i32
  }
  func.func @transform_5(%arg0: i32) -> (i32, i32) {
    %c0_i32 = arith.constant 0 : i32
    %c0_i32_0 = arith.constant 0 : i32
    return %c0_i32, %arg0 : i32, i32
  }
}

</mosaic_0001>

<bundles_post_ra>
// kernel: geovec_mlp_relu_folded.1
= control target key start
LH: loop header
LB: loop body
LE: loop exit
PB: predicated region body
PF: predicated region fallthrough
CT: control target
= control target key end

     0   :  { %vm65_vm0 = vcmask 195584   ;;  %v741_v3 = vmov 0   ;;  %vm438_vm1 = vcmask 392192   ;;  %s1009_s0 = inlined_call_operand.vmem [shape: f32[24,128], index: 0, kind: input, shape index: {}]   ;;  %s1010_s1 = inlined_call_operand.vmem [shape: f32[48,24], index: 1, kind: input, shape index: {}]   ;;  %s1011_s2 = inlined_call_operand.vmem [shape: f32[48,1], index: 2, kind: input, shape index: {}]   ;;  %s1012_s4 = inlined_call_operand.vmem [shape: f32[24,1], index: 4, kind: input, shape index: {}]   ;;  %s1013_s3 = inlined_call_operand.vmem [shape: f32[24,48], index: 3, kind: input, shape index: {}]   ;;  %s1014_s5 = inlined_call_operand.vmem [shape: f32[24,128], index: 5, kind: output, shape index: {}]  }
   0x1   :  { %v775_v0 = vld [vmem:[%s1009_s0 + $0x10] sm:$0xff]  ;;  %v780_v1 = vld [vmem:[%s1009_s0 + $0x8] sm:$0xff]  ;;  %v785_v2 = vld [vmem:[%s1009_s0] sm:$0xff]  ;;  %739 = vset.pattern.permute.xlu1 %v741_v3  ;;  %740 = vset.pattern.permute.xlu2 %v741_v3 }
   0x2   :  { %v788_v4 = vand.u32 4294901760, %v775_v0  ;;  %v791_v5 = vand.u32 4294901760, %v780_v1  ;;  %v794_v6 = vand.u32 4294901760, %v785_v2  ;;  %v23_v7 = vld [vmem:[%s1010_s1] sm:$0xff]  ;;  %v28_v8 = vld [vmem:[%s1010_s1 + $0x28] sm:$0xff]  ;;  %738 = vset.pattern.permute.xlu0 %v741_v3  ;;  %v25_v13 = vld [vmem:[%s1010_s1 + $0x10] sm:$0xff] }
   0x3   :  { %v24_v9 = vld [vmem:[%s1010_s1 + $0x8] sm:$0xff]  ;;  %v67_v10 = vsel %vm65_vm0, %v23_v7, 0  ;;  %v82_v11 = vsel %vm65_vm0, %v28_v8, 0  ;;  %v32_v14 = vld [vmem:[%s1011_s2 + $0x18] sm:$0xff]  ;;  %v73_v21 = vsel %vm65_vm0, %v25_v13, 0  ;;  %v31_v38 = vld [vmem:[%s1011_s2 + $0x10] sm:$0xff] }
   0x4   :  { %v70_v12 = vsel %vm65_vm0, %v24_v9, 0  ;;  %98 = vmatpush.msra.mxu0 %v788_v4  ;;  %731 = vmatpush.msra.mxu2 %v788_v4  ;;  %v166_v15 = vsub.f32 %v775_v0, %v788_v4  ;;  %v818_v16 = vand.u32 4294901760, %v67_v10  ;;  %v820_v17 = vand.u32 4294901760, %v82_v11  ;;  %v30_v39 = vld [vmem:[%s1011_s2 + $0x8] sm:$0xff]  ;;  %v26_v43 = vld [vmem:[%s1010_s1 + $0x18] sm:$0xff]  ;;  %v29_v52 = vld [vmem:[%s1011_s2] sm:$0xff] }
   0x5   :  { %v172_v18 = vsub.f32 %v780_v1, %v791_v5  ;;  %v178_v19 = vsub.f32 %v785_v2, %v794_v6  ;;  %v826_v20 = vand.u32 4294901760, %v70_v12  ;;  %52 = vperm.xlu1 %739, %v32_v14   ;;  %v844_v33 = vand.u32 4294901760, %v73_v21  ;;  %42 = vperm.xlu2 %740, %v30_v39   ;;  %v34_v51 = vld [vmem:[%s1011_s2 + $0x28] sm:$0xff]  ;;  %v27_v53 = vld [vmem:[%s1010_s1 + $0x20] sm:$0xff]  ;;  %v422_v8 = vld [vmem:[%s1012_s4 + $0x10] sm:$0xff] }
   0x6   :  { %100 = vmatpush.msra.mxu0 %v791_v5  ;;  %732 = vmatpush.msra.mxu2 %v791_v5  ;;  %v167_v22 = vand.u32 4294901760, %v166_v15  ;;  %v832_v23 = vsub.f32 %v67_v10, %v818_v16  ;;  %v835_v24 = vsub.f32 %v82_v11, %v820_v17  ;;  %v76_v47 = vsel %vm65_vm0, %v26_v43, 0  ;;  %v33_v60 = vld [vmem:[%s1011_s2 + $0x20] sm:$0xff]  ;;  %v421_v7 = vld [vmem:[%s1012_s4 + $0x8] sm:$0xff] }
   0x7   :  { %v173_v25 = vand.u32 4294901760, %v172_v18  ;;  %v179_v26 = vand.u32 4294901760, %v178_v19  ;;  %v838_v27 = vsub.f32 %v70_v12, %v826_v20  ;;  %v120_v46 = vsub.f32 %v73_v21, %v844_v33  ;;  %62 = vperm.xlu0 %738, %v34_v51  }
   0x8   :  { %102 = vmatpush.msra.mxu0 %v794_v6  ;;  %733 = vmatpush.msra.mxu2 %v794_v6  ;;  %v168_v28 = vsub.f32 %v166_v15, %v167_v22  ;;  %v105_v29 = vand.u32 4294901760, %v832_v23  ;;  %v145_v30 = vand.u32 4294901760, %v835_v24  ;;  %v127_v50 = vand.u32 4294901760, %v76_v47 }
   0x9   :  { %v174_v31 = vsub.f32 %v172_v18, %v173_v25  ;;  %v180_v32 = vsub.f32 %v178_v19, %v179_v26  ;;  %v113_v37 = vand.u32 4294901760, %v838_v27  ;;  %v121_v49 = vand.u32 4294901760, %v120_v46 }
   0xa   :  { %223 = vmatpush.msrb.mxu2 %v166_v15  ;;  %333 = vmatpush.msrb.mxu0 %v167_v22  ;;  %v169_v34 = vand.u32 4294901760, %v168_v28  ;;  %v106_v35 = vsub.f32 %v832_v23, %v105_v29  ;;  %v146_v36 = vsub.f32 %v835_v24, %v145_v30  ;;  %v128_v55 = vsub.f32 %v76_v47, %v127_v50 }
   0xb   :  { %v175_v40 = vand.u32 4294901760, %v174_v31  ;;  %v181_v44 = vand.u32 4294901760, %v180_v32  ;;  %v114_v45 = vsub.f32 %v838_v27, %v113_v37  ;;  %v122_v54 = vsub.f32 %v120_v46, %v121_v49 }
   0xc   :  { %226 = vmatpush.msrb.mxu2 %v172_v18  ;;  %170 = vmatpush.msra.mxu1 %v169_v34  ;;  %v107_v41 = vand.u32 4294901760, %v106_v35  ;;  %v147_v42 = vand.u32 4294901760, %v146_v36  ;;  %v79_v56 = vsel %vm65_vm0, %v27_v53, 0  ;;  %v129_v58 = vand.u32 4294901760, %v128_v55 }
   0xd   :  { %734 = vmatpush.msra.mxu3 %v169_v34  ;;  %47 = vperm.xlu1 %739, %v31_v38   ;;  %v115_v48 = vand.u32 4294901760, %v114_v45  ;;  %v123_v57 = vand.u32 4294901760, %v122_v54  ;;  %v135_v59 = vand.u32 4294901760, %v79_v56 }
   0xe   :  { %229 = vmatpush.msrb.mxu2 %v178_v19  ;;  %108 = vmatmul.f32.vlgmr.msra.gmra.mxu0 %v107_v41  ;;  %v130_v61 = vsub.f32 %v128_v55, %v129_v58 }
   0xf   :  { %148 = vmatmul.f32.vlgmr.msra.gmra.mxu2 %v147_v42  ;;  %176 = vmatpush.msra.mxu1 %v175_v40  ;;  %v136_v62 = vsub.f32 %v79_v56, %v135_v59 }
  0x10   :  { %735 = vmatpush.msra.mxu3 %v175_v40  ;;  %337 = vmatpush.msrb.mxu0 %v173_v25  ;;  %v131_v63 = vand.u32 4294901760, %v130_v61 }
  0x11   :  { %182 = vmatpush.msra.mxu1 %v181_v44  ;;  %37 = vperm.xlu2 %740, %v29_v52   ;;  %v137_v3 = vand.u32 4294901760, %v136_v62 }
  0x12   :  { %736 = vmatpush.msra.mxu3 %v181_v44  ;;  %184 = vmatmul.f32.vlgmr.msra.gmra.mxu1 %v818_v16 }
  0x13   :  { %204 = vmatmul.f32.vlgmr.msra.gmra.mxu3 %v820_v17  ;;  %341 = vmatpush.msrb.mxu0 %v179_v26 }
  0x14   :  { %275 = vmatpush.msrb.mxu3 %v788_v4  ;;  %381 = vmatpush.msrb.mxu1 %v788_v4  ;;  %v138_v4 = vsub.f32 %v136_v62, %v137_v3 }
  0x15   :  { %57 = vperm.xlu0 %738, %v33_v60   ;;  %430 = vperm.xlu1 %739, %v421_v7  }
  0x16   :  { %277 = vmatpush.msrb.mxu3 %v791_v5  ;;  %116 = vmatmul.f32.gmra.mxu0 %v115_v48 }
  0x17   :  { %232 = vmatmul.f32.vlgmr.msrb.gmra.mxu2 %v832_v23  ;;  %383 = vmatpush.msrb.mxu1 %v791_v5  ;;  %v139_v5 = vand.u32 4294901760, %v138_v4 }
  0x18   :  { %279 = vmatpush.msrb.mxu3 %v794_v6 }
  0x19   :  { %385 = vmatpush.msrb.mxu1 %v794_v6  ;;  %v420_v6 = vld [vmem:[%s1012_s4] sm:$0xff]  ;;  %435 = vperm.xlu2 %740, %v422_v8  }
  0x1a   :  { %188 = vmatmul.f32.gmra.mxu1 %v826_v20 }
  0x1b   :  { %283 = vmatmul.f32.vlgmr.msrb.gmra.mxu3 %v105_v29 }
  0x1d   :  { %425 = vperm.xlu0 %738, %v420_v6  }
  0x1e   :  { %124 = vmatmul.f32.gmra.mxu0 %v123_v57 }
  0x1f   :  { %237 = vmatmul.f32.gmra.mxu2 %v838_v27 }
  0x22   :  { %192 = vmatmul.f32.gmra.mxu1 %v844_v33 }
  0x23   :  { %289 = vmatmul.f32.gmra.mxu3 %v113_v37 }
  0x26   :  { %132 = vmatmul.f32.gmra.mxu0 %v131_v63 }
  0x27   :  { %242 = vmatmul.f32.gmra.mxu2 %v120_v46 }
  0x2a   :  { %196 = vmatmul.f32.gmra.mxu1 %v127_v50 }
  0x2b   :  { %295 = vmatmul.f32.gmra.mxu3 %v121_v49 }
  0x2e   :  { %140 = vmatmul.f32.gmra.mxu0 %v139_v5 }
  0x2f   :  { %247 = vmatmul.f32.gmra.mxu2 %v128_v55 }
  0x32   :  { %200 = vmatmul.f32.gmra.mxu1 %v135_v59 }
  0x33   :  { %301 = vmatmul.f32.gmra.mxu3 %v129_v58 }
  0x36   :  { %343 = vmatmul.f32.vlgmr.msrb.gmra.mxu0 %v818_v16 }
  0x37   :  { %252 = vmatmul.f32.gmra.mxu2 %v136_v62 }
  0x3a   :  { %387 = vmatmul.f32.vlgmr.msrb.gmra.mxu1 %v818_v16 }
  0x3b   :  { %307 = vmatmul.f32.gmra.mxu3 %v137_v3 }
  0x3e   :  { %347 = vmatmul.f32.gmra.mxu0 %v826_v20 }
  0x3f   :  { %257 = vmatmul.f32.gmra.mxu2 %v835_v24 }
  0x42   :  { %391 = vmatmul.f32.gmra.mxu1 %v826_v20 }
  0x43   :  { %313 = vmatmul.f32.gmra.mxu3 %v145_v30 }
  0x46   :  { %351 = vmatmul.f32.gmra.mxu0 %v844_v33 }
  0x4a   :  { %395 = vmatmul.f32.gmra.mxu1 %v844_v33 }
  0x4e   :  { %355 = vmatmul.f32.gmra.mxu0 %v127_v50 }
  0x52   :  { %399 = vmatmul.f32.gmra.mxu1 %v127_v50 }
  0x56   :  { %359 = vmatmul.f32.gmra.mxu0 %v135_v59 }
  0x5a   :  { %403 = vmatmul.f32.gmra.mxu1 %v135_v59 }
  0x5e   :  { %363 = vmatmul.f32.gmra.mxu0 %v820_v17 }
  0x5f   :  { %v43_v9 = vpop.permute.xlu2 %42 }
  0x62   :  { %407 = vmatmul.f32.gmra.mxu1 %v820_v17 }
  0x6b   :  { %v38_v10 = vpop.permute.xlu2 %37 }
  0x77   :  { %v53_v38 = vpop.permute.xlu1 %52 }
  0x79   :  { %v63_v36 = vpop.permute.xlu0 %62 }
  0x7f   :  { %v48_v44 = vpop.permute.xlu1 %47 }
  0x87   :  { %v58_v43 = vpop.permute.xlu0 %57 }
  0x8b   :  { %v109_v11 = vpop.f32.mrf.mxu0 }
  0x8c   :  { %v110_v12 = vadd.f32 %v109_v11, %v38_v10 }
  0x8f   :  { %v185_v13 = vpop.f32.mrf.mxu1 }
  0x90   :  { %v186_v14 = vadd.f32 %v185_v13, %v110_v12 }
  0x92   :  { %v149_v20 = vpop.f32.mrf.mxu2 }
  0x93   :  { %v117_v15 = vpop.f32.mrf.mxu0  ;;  %v150_v58 = vadd.f32 %v149_v20, %v63_v36 }
  0x94   :  { %v118_v16 = vadd.f32 %v117_v15, %v43_v9  ;;  %v417_v9 = vld [vmem:[%s1013_s3] sm:$0xff] }
  0x96   :  { %v205_v22 = vpop.f32.mrf.mxu3 }
  0x97   :  { %v189_v18 = vpop.f32.mrf.mxu1  ;;  %v206_v10 = vadd.f32 %v205_v22, %v150_v58 }
  0x98   :  { %v190_v19 = vadd.f32 %v189_v18, %v118_v16 }
  0x9a   :  { %v233_v25 = vpop.f32.mrf.mxu2 }
  0x9b   :  { %v125_v21 = vpop.f32.mrf.mxu0  ;;  %v234_v5 = vadd.f32 %v233_v25, %v186_v14  ;;  %v440_v14 = vsel %vm438_vm1, %v417_v9, 0 }
  0x9c   :  { %v126_v49 = vadd.f32 %v125_v21, %v48_v44 }
  0x9e   :  { %v284_v26 = vpop.f32.mrf.mxu3 }
  0x9f   :  { %v193_v23 = vpop.f32.mrf.mxu1  ;;  %v285_v15 = vadd.f32 %v284_v26, %v234_v5 }
  0xa0   :  { %v194_v54 = vadd.f32 %v193_v23, %v126_v49 }
  0xa2   :  { %v238_v17 = vpop.f32.mrf.mxu2 }
  0xa3   :  { %v133_v24 = vpop.f32.mrf.mxu0  ;;  %v239_v62 = vadd.f32 %v238_v17, %v190_v19 }
  0xa4   :  { %v134_v46 = vadd.f32 %v133_v24, %v53_v38 }
  0xa6   :  { %v290_v30 = vpop.f32.mrf.mxu3 }
  0xa7   :  { %v197_v27 = vpop.f32.mrf.mxu1  ;;  %v291_v6 = vadd.f32 %v290_v30, %v239_v62 }
  0xa8   :  { %v198_v52 = vadd.f32 %v197_v27, %v134_v46 }
  0xaa   :  { %v243_v33 = vpop.f32.mrf.mxu2 }
  0xab   :  { %v141_v28 = vpop.f32.mrf.mxu0  ;;  %v244_v59 = vadd.f32 %v243_v33, %v194_v54  ;;  %v419_v54 = vld [vmem:[%s1013_s3 + $0x10] sm:$0xff] }
  0xac   :  { %v142_v47 = vadd.f32 %v141_v28, %v58_v43 }
  0xae   :  { %v296_v34 = vpop.f32.mrf.mxu3 }
  0xaf   :  { %v201_v29 = vpop.f32.mrf.mxu1  ;;  %v297_v63 = vadd.f32 %v296_v34, %v244_v59 }
  0xb0   :  { %v202_v53 = vadd.f32 %v201_v29, %v142_v47  ;;  %v912_v29 = vand.u32 4294901760, %v440_v14 }
  0xb2   :  { %v248_v39 = vpop.f32.mrf.mxu2 }
  0xb3   :  { %v344_v31 = vpop.f32.mrf.mxu0  ;;  %v249_v55 = vadd.f32 %v248_v39, %v198_v52 }
  0xb4   :  { %v345_v23 = vadd.f32 %v344_v31, %v285_v15  ;;  %v418_v31 = vld [vmem:[%s1013_s3 + $0x8] sm:$0xff] }
  0xb6   :  { %v302_v41 = vpop.f32.mrf.mxu3 }
  0xb7   :  { %v388_v32 = vpop.f32.mrf.mxu1  ;;  %v303_v60 = vadd.f32 %v302_v41, %v249_v55  ;;  %v443_v41 = vsel %vm438_vm1, %v418_v31, 0 }
  0xb8   :  { %v389_v17 = vadd.f32 %v388_v32, %v345_v23 }
  0xba   :  { %v253_v48 = vpop.f32.mrf.mxu2  ;;  %v411_v38 = vmax.f32 %v389_v17, 0.0 }
  0xbb   :  { %v348_v35 = vpop.f32.mrf.mxu0  ;;  %v254_v56 = vadd.f32 %v253_v48, %v202_v53 }
  0xbc   :  { %v349_v16 = vadd.f32 %v348_v35, %v291_v6 }
  0xbe   :  { %v308_v50 = vpop.f32.mrf.mxu3 }
  0xbf   :  { %v392_v37 = vpop.f32.mrf.mxu1  ;;  %v309_v61 = vadd.f32 %v308_v50, %v254_v56  ;;  %v944_v50 = vand.u32 4294901760, %v443_v41 }
  0xc0   :  { %v393_v25 = vadd.f32 %v392_v37, %v349_v16  ;;  %v922_v37 = vsub.f32 %v440_v14, %v912_v29 }
  0xc2   :  { %v258_v7 = vpop.f32.mrf.mxu2  ;;  %v412_v34 = vmax.f32 %v393_v25, 0.0  ;;  %v472_v46 = vand.u32 4294901760, %v922_v37 }
  0xc3   :  { %v352_v40 = vpop.f32.mrf.mxu0  ;;  %v259_v19 = vadd.f32 %v258_v7, %v206_v10 }
  0xc4   :  { %v353_v11 = vadd.f32 %v352_v40, %v297_v63  ;;  %v473_v56 = vsub.f32 %v922_v37, %v472_v46 }
  0xc6   :  { %v314_v18 = vpop.f32.mrf.mxu3 }
  0xc7   :  { %v396_v42 = vpop.f32.mrf.mxu1  ;;  %v315_v27 = vadd.f32 %v314_v18, %v259_v19 }
  0xc8   :  { %v397_v20 = vadd.f32 %v396_v42, %v353_v11  ;;  %v928_v42 = vand.u32 4294901760, %v412_v34 }
  0xca   :  { %v413_v22 = vmax.f32 %v397_v20, 0.0 }
  0xcb   :  { %v356_v45 = vpop.f32.mrf.mxu0 }
  0xcc   :  { %v357_v3 = vadd.f32 %v356_v45, %v303_v60  ;;  %v924_v32 = vand.u32 4294901760, %v413_v22  ;;  %v935_v45 = vand.u32 4294901760, %v411_v38  ;;  %v962_v60 = vsub.f32 %v443_v41, %v944_v50 }
  0xce   :  { %v939_v47 = vsub.f32 %v413_v22, %v924_v32  ;;  %v536_v55 = vsub.f32 %v411_v38, %v935_v45 }
  0xcf   :  { %v400_v51 = vpop.f32.mrf.mxu1 }
  0xd0   :  { %v401_v12 = vadd.f32 %v400_v51, %v357_v3  ;;  %v947_v51 = vsub.f32 %v412_v34, %v928_v42  ;;  %v525_v59 = vand.u32 4294901760, %v939_v47  ;;  %v537_v5 = vand.u32 4294901760, %v536_v55 }
  0xd2   :  { %v414_v28 = vmax.f32 %v401_v12, 0.0  ;;  %v531_v3 = vand.u32 4294901760, %v947_v51  ;;  %v526_v7 = vsub.f32 %v939_v47, %v525_v59 }
  0xd3   :  { %v360_v57 = vpop.f32.mrf.mxu0 }
  0xd4   :  { %v361_v4 = vadd.f32 %v360_v57, %v309_v61  ;;  %v916_v35 = vand.u32 4294901760, %v414_v28  ;;  %v446_v61 = vsel %vm438_vm1, %v419_v54, 0  ;;  %v532_v11 = vsub.f32 %v947_v51, %v531_v3 }
  0xd5   :  { %v486_v9 = vand.u32 4294901760, %v446_v61  ;;  %v527_v12 = vand.u32 4294901760, %v526_v7 }
  0xd6   :  { %v931_v43 = vsub.f32 %v414_v28, %v916_v35  ;;  %v533_v18 = vand.u32 4294901760, %v532_v11 }
  0xd7   :  { %v404_v8 = vpop.f32.mrf.mxu1  ;;  %v487_v16 = vsub.f32 %v446_v61, %v486_v9 }
  0xd8   :  { %v405_v13 = vadd.f32 %v404_v8, %v361_v4  ;;  %v519_v53 = vand.u32 4294901760, %v931_v43  ;;  %v474_v4 = vand.u32 4294901760, %v473_v56  ;;  %v480_v8 = vand.u32 4294901760, %v962_v60 }
  0xda   :  { %v415_v21 = vmax.f32 %v405_v13, 0.0  ;;  %v520_v63 = vsub.f32 %v931_v43, %v519_v53  ;;  %v538_v13 = vsub.f32 %v536_v55, %v537_v5  ;;  %v481_v15 = vsub.f32 %v962_v60, %v480_v8 }
  0xdb   :  { %v364_v24 = vpop.f32.mrf.mxu0 }
  0xdc   :  { %v914_v30 = vand.u32 4294901760, %v415_v21  ;;  %v365_v33 = vadd.f32 %v364_v24, %v315_v27  ;;  %v521_v10 = vand.u32 4294901760, %v520_v63  ;;  %v539_v19 = vand.u32 4294901760, %v538_v13 }
  0xdd   :  { %v482_v20 = vand.u32 4294901760, %v481_v15 }
  0xde   :  { %v512_v39 = vsub.f32 %v415_v21, %v914_v30  ;;  %v488_v21 = vand.u32 4294901760, %v487_v16 }
  0xdf   :  { %v408_v26 = vpop.f32.mrf.mxu1 }
  0xe0   :  { %v409_v36 = vadd.f32 %v408_v26, %v365_v33  ;;  %v513_v49 = vand.u32 4294901760, %v512_v39  ;;  %v489_v14 = vsub.f32 %v487_v16, %v488_v21 }
  0xe2   :  { %v416_v40 = vmax.f32 %v409_v36, 0.0  ;;  %v514_v58 = vsub.f32 %v512_v39, %v513_v49  ;;  %v490_v23 = vand.u32 4294901760, %v489_v14 }
  0xe4   :  { %v933_v44 = vand.u32 4294901760, %v416_v40  ;;  %v515_v6 = vand.u32 4294901760, %v514_v58 }
  0xe6   :  { %v506_v48 = vsub.f32 %v416_v40, %v933_v44  ;;  %459 = vmatpush.msra.mxu2 %v933_v44  ;;  %697 = vmatpush.msra.mxu1 %v933_v44 }
  0xe8   :  { %v507_v52 = vand.u32 4294901760, %v506_v48  ;;  %461 = vmatpush.msra.mxu2 %v914_v30  ;;  %699 = vmatpush.msra.mxu1 %v914_v30 }
  0xea   :  { %v508_v57 = vsub.f32 %v506_v48, %v507_v52  ;;  %463 = vmatpush.msra.mxu2 %v916_v35  ;;  %652 = vmatpush.msra.mxu0 %v507_v52 }
  0xeb   :  { %701 = vmatpush.msra.mxu1 %v916_v35 }
  0xec   :  { %465 = vmatpush.msra.mxu2 %v924_v32  ;;  %656 = vmatpush.msra.mxu0 %v513_v49  ;;  %v509_v62 = vand.u32 4294901760, %v508_v57  ;;  %v436_v49 = vpop.permute.xlu2 %435 }
  0xed   :  { %703 = vmatpush.msra.mxu1 %v924_v32 }
  0xee   :  { %467 = vmatpush.msra.mxu2 %v928_v42  ;;  %510 = vmatpush.msra.mxu3 %v509_v62 }
  0xef   :  { %660 = vmatpush.msra.mxu0 %v519_v53  ;;  %705 = vmatpush.msra.mxu1 %v928_v42 }
  0xf0   :  { %469 = vmatpush.msra.mxu2 %v935_v45  ;;  %516 = vmatpush.msra.mxu3 %v515_v6 }
  0xf1   :  { %664 = vmatpush.msra.mxu0 %v525_v59  ;;  %707 = vmatpush.msra.mxu1 %v935_v45 }
  0xf2   :  { %475 = vmatmul.f32.vlgmr.msra.gmra.mxu2 %v474_v4  ;;  %522 = vmatpush.msra.mxu3 %v521_v10 }
  0xf3   :  { %566 = vmatpush.msrb.mxu2 %v506_v48  ;;  %668 = vmatpush.msra.mxu0 %v531_v3 }
  0xf4   :  { %528 = vmatpush.msra.mxu3 %v527_v12  ;;  %709 = vmatmul.f32.vlgmr.msra.gmra.mxu1 %v912_v29 }
  0xf5   :  { %569 = vmatpush.msrb.mxu2 %v512_v39  ;;  %672 = vmatpush.msra.mxu0 %v537_v5 }
  0xf6   :  { %534 = vmatpush.msra.mxu3 %v533_v18  ;;  %674 = vmatmul.f32.vlgmr.msra.gmra.mxu0 %v912_v29 }
  0xf7   :  { %572 = vmatpush.msrb.mxu2 %v931_v43 }
  0xf8   :  { %540 = vmatpush.msra.mxu3 %v539_v19 }
  0xf9   :  { %575 = vmatpush.msrb.mxu2 %v939_v47  ;;  %542 = vmatmul.f32.vlgmr.msra.gmra.mxu3 %v912_v29 }
  0xfa   :  { %483 = vmatmul.f32.gmra.mxu2 %v482_v20  ;;  %609 = vmatpush.msrb.mxu3 %v933_v44 }
  0xfb   :  { %578 = vmatpush.msrb.mxu2 %v947_v51 }
  0xfc   :  { %611 = vmatpush.msrb.mxu3 %v914_v30  ;;  %713 = vmatmul.f32.gmra.mxu1 %v944_v50  ;;  %v426_v30 = vpop.permute.xlu0 %425 }
  0xfd   :  { %581 = vmatpush.msrb.mxu2 %v536_v55 }
  0xfe   :  { %613 = vmatpush.msrb.mxu3 %v916_v35  ;;  %678 = vmatmul.f32.gmra.mxu0 %v944_v50 }
 0x100   :  { %615 = vmatpush.msrb.mxu3 %v924_v32 }
 0x101   :  { %546 = vmatmul.f32.gmra.mxu3 %v944_v50 }
 0x102   :  { %491 = vmatmul.f32.gmra.mxu2 %v490_v23  ;;  %617 = vmatpush.msrb.mxu3 %v928_v42 }
 0x104   :  { %619 = vmatpush.msrb.mxu3 %v935_v45  ;;  %717 = vmatmul.f32.gmra.mxu1 %v486_v9 }
 0x106   :  { %682 = vmatmul.f32.gmra.mxu0 %v486_v9 }
 0x109   :  { %550 = vmatmul.f32.gmra.mxu3 %v486_v9 }
 0x10a   :  { %584 = vmatmul.f32.vlgmr.msrb.gmra.mxu2 %v922_v37  ;;  %v431_v37 = vpop.permute.xlu1 %430 }
 0x111   :  { %623 = vmatmul.f32.vlgmr.msrb.gmra.mxu3 %v472_v46 }
 0x112   :  { %589 = vmatmul.f32.gmra.mxu2 %v962_v60 }
 0x119   :  { %629 = vmatmul.f32.gmra.mxu3 %v480_v8 }
 0x11a   :  { %594 = vmatmul.f32.gmra.mxu2 %v487_v16 }
 0x121   :  { %635 = vmatmul.f32.gmra.mxu3 %v488_v21 }
 0x171   :  { %v710_v35 = vpop.f32.mrf.mxu1 }
 0x173   :  { %v675_v26 = vpop.f32.mrf.mxu0 }
 0x175   :  { %v476_v24 = vpop.f32.mrf.mxu2 }
 0x176   :  { %v477_v33 = vadd.f32 %v476_v24, %v426_v30 }
 0x179   :  { %v714_v47 = vpop.f32.mrf.mxu1 }
 0x17b   :  { %v679_v43 = vpop.f32.mrf.mxu0 }
 0x17c   :  { %v543_v25 = vpop.f32.mrf.mxu3 }
 0x17d   :  { %v484_v27 = vpop.f32.mrf.mxu2  ;;  %v544_v34 = vadd.f32 %v543_v25, %v477_v33 }
 0x17e   :  { %v485_v39 = vadd.f32 %v484_v27, %v431_v37 }
 0x181   :  { %v718_v59 = vpop.f32.mrf.mxu1 }
 0x183   :  { %v683_v58 = vpop.f32.mrf.mxu0 }
 0x184   :  { %v547_v28 = vpop.f32.mrf.mxu3 }
 0x185   :  { %v492_v17 = vpop.f32.mrf.mxu2  ;;  %v548_v41 = vadd.f32 %v547_v28, %v485_v39 }
 0x186   :  { %v493_v50 = vadd.f32 %v492_v17, %v436_v49 }
 0x18c   :  { %v551_v29 = vpop.f32.mrf.mxu3 }
 0x18d   :  { %v585_v22 = vpop.f32.mrf.mxu2  ;;  %v552_v53 = vadd.f32 %v551_v29, %v493_v50 }
 0x18e   :  { %v586_v36 = vadd.f32 %v585_v22, %v544_v34 }
 0x194   :  { %v624_v31 = vpop.f32.mrf.mxu3 }
 0x195   :  { %v625_v38 = vadd.f32 %v624_v31, %v586_v36  ;;  %v590_v32 = vpop.f32.mrf.mxu2 }
 0x196   :  { %v591_v44 = vadd.f32 %v590_v32, %v548_v41 }
 0x197   :  { %v676_v40 = vadd.f32 %v675_v26, %v625_v38 }
 0x199   :  { %v711_v42 = vadd.f32 %v710_v35, %v676_v40 }
 0x19b   :  { %v721_v45 = vadd.f32 %v711_v42, %v785_v2 }
 0x19c   :  { %v630_v46 = vpop.f32.mrf.mxu3 }
 0x19d   :  { %724 = vst [vmem:[%s1014_s5] sm:$0xff] %v721_v45  ;;  %v631_v48 = vadd.f32 %v630_v46, %v591_v44  ;;  %v595_v52 = vpop.f32.mrf.mxu2 }
 0x19e   :  { %v596_v55 = vadd.f32 %v595_v52, %v552_v53 }
 0x19f   :  { %v680_v51 = vadd.f32 %v679_v43, %v631_v48 }
 0x1a1   :  { %v715_v54 = vadd.f32 %v714_v47, %v680_v51 }
 0x1a3   :  { %v722_v56 = vadd.f32 %v715_v54, %v780_v1 }
 0x1a4   :  { %v636_v57 = vpop.f32.mrf.mxu3 }
 0x1a5   :  { %725 = vst [vmem:[%s1014_s5 + $0x8] sm:$0xff] %v722_v56  ;;  %v637_v2 = vadd.f32 %v636_v57, %v596_v55 }
 0x1a7   :  { %v684_v60 = vadd.f32 %v683_v58, %v637_v2 }
 0x1a9   :  { %v719_v61 = vadd.f32 %v718_v59, %v684_v60 }
 0x1ab   :  { %v723_v62 = vadd.f32 %v719_v61, %v775_v0 }
 0x1ad   :  { %726 = vst [vmem:[%s1014_s5 + $0x10] sm:$0xff] %v723_v62 }

</bundles_post_ra>
